<compile_context>
chip_gen: v7x
topology: tpu7x:2x2x1
jax: 0.10.0
libtpu: 0.0.40
codegen_flags: <defaults>
</compile_context>

<pallas_src>
import functools

import jax
import jax.numpy as jnp
from jax.experimental import pallas as pl
from jax.experimental.pallas import tpu as pltpu

LANES = 128
SUBLANES = 8
VMEM_LIMIT = 32 * 1024 * 1024    # explicit, safe on v5e/v6e/v7x


def _cdiv(a, b):
    return -(-a // b)


def _round_up(a, b):
    return _cdiv(a, b) * b


def _chip_params():
    """Returns (target_block_elems, max_splits) tuned per TPU generation."""
    kind = ""
    try:
        kind = jax.devices()[0].device_kind.lower()
    except Exception:  # pragma: no cover - defensive; fall back to safe values
        pass
    if "v7" in kind:
        # 2 TensorCores / ~3.2 TB/s per TC: bigger blocks + 2-way split.
        return 4096 * LANES, 2
    # Single-TensorCore chips (v5e / v6e): 1 MiB f32 blocks, no split.
    return 2048 * LANES, 1


def _mask_l1_reduce_kernel(inp_ref, tgt_ref, num_ref, den_ref, *,
                           lanes, tile_rows, total_chunks, chunks_per_split,
                           tail_rows, has_duplicate):
    """Accumulates (1, 8, lanes) vector partial sums of l1 and mask."""
    c = pl.program_id(0)
    i = pl.program_id(1)

    @pl.when(i == 0)
    def _init():
        num_ref[...] = jnp.zeros_like(num_ref)
        den_ref[...] = jnp.zeros_like(den_ref)

    block_idx = c * chunks_per_split + i

    def body():
        # Keep the elementwise stage in the native dtype (bf16 stays bf16 on
        # v6e/v7x); upcast only the selected l1 / mask before accumulation.
        inp = inp_ref[...]
        tgt = tgt_ref[...]
        keep = tgt != -100.0

        def accumulate(k):
            # Keep the select (where) form: OOB block reads may be NaN and a
            # multiply-by-mask formulation would propagate them.
            l1 = jnp.where(k, jnp.abs(inp - tgt), 0.0).astype(jnp.float32)
            msk = k.astype(jnp.float32)
            num_ref[...] += l1.reshape(-1, SUBLANES, lanes).sum(
                axis=0, keepdims=True)
            den_ref[...] += msk.reshape(-1, SUBLANES, lanes).sum(
                axis=0, keepdims=True)

        if tail_rows == tile_rows:
            # Every block is full: no row-validity masking anywhere.
            accumulate(keep)
        else:
            # Only the very last block can be partial; steady-state blocks
            # skip the iota/compare entirely.
            @pl.when(block_idx != total_chunks - 1)
            def _steady():
                accumulate(keep)

            @pl.when(block_idx == total_chunks - 1)
            def _tail():
                row = jax.lax.broadcasted_iota(
                    jnp.int32, (tile_rows, lanes), 0)
                accumulate(jnp.logical_and(keep, row < tail_rows))

    if has_duplicate:
        # Uneven 2-way split: the last split re-reads (index-clamped) an
        # already-processed block on its final step; skip the compute.
        @pl.when(block_idx < total_chunks)
        def _valid():
            body()
    else:
        body()


def _mask_l1_none_kernel(inp_ref, tgt_ref, out_ref):
    inp = inp_ref[...]
    tgt = tgt_ref[...]
    keep = tgt != -100.0
    out_ref[...] = jnp.where(keep, jnp.abs(inp - tgt), 0.0).astype(out_ref.dtype)


def _as_2d_view(x, t):
    """Free (no-copy) 2-D view of both tensors: (rows, lanes)."""
    n = x.size
    if n % LANES == 0:
        lanes = LANES                       # fully lane-dense view
    else:
        # Collapse leading dims; trailing dim becomes the lane dim.  Block
        # last dim == full array dim, so the (8,128) rule is still satisfied.
        # TODO(synk): a huge 1-D array with odd length would make `lanes`
        # itself huge; not a shape this module ever sees.
        lanes = x.shape[-1]
    rows = n // lanes
    return x.reshape(rows, lanes), t.reshape(rows, lanes), rows, lanes


def mask_l1_loss(input_, target, gamma=2.0, reduction="mean"):
    """JAX/Pallas equivalent of MaskL1Loss(gamma, reduction)(input, target)."""
    del gamma  # unused in the PyTorch forward as well
    if input_.shape != target.shape:
        raise ValueError("input and target must have the same shape")

    orig_shape = input_.shape
    inp2d, tgt2d, rows, lanes = _as_2d_view(input_, target)

    target_block_elems, max_splits = _chip_params()
    tile_rows = max(SUBLANES,
                    (target_block_elems // max(lanes, 1)) // SUBLANES * SUBLANES)
    tile_rows = min(tile_rows, _round_up(rows, SUBLANES))
    total_chunks = _cdiv(rows, tile_rows)
    tail_rows = rows - (total_chunks - 1) * tile_rows   # rows in last block

    if reduction == "none":
        spec = pl.BlockSpec((tile_rows, lanes), lambda i: (i, 0))
        out2d = pl.pallas_call(
            _mask_l1_none_kernel,
            out_shape=jax.ShapeDtypeStruct((rows, lanes), jnp.float32),
            grid=(total_chunks,),
            in_specs=[spec, spec],
            out_specs=spec,
            compiler_params=pltpu.CompilerParams(
                dimension_semantics=("parallel",),
                vmem_limit_bytes=VMEM_LIMIT),
        )(inp2d, tgt2d)
        return out2d.reshape(orig_shape)

    if reduction not in ("mean", "sum"):
        raise ValueError(f"unknown reduction: {reduction}")

    num_splits = max_splits if total_chunks >= max_splits else 1
    chunks_per_split = _cdiv(total_chunks, num_splits)
    has_duplicate = num_splits * chunks_per_split > total_chunks

    if has_duplicate:
        def in_map(c, i):
            # Clamp so the extra step of the last split re-reads a valid
            # block; the kernel skips its contribution.
            return (jnp.minimum(c * chunks_per_split + i, total_chunks - 1), 0)
    else:
        def in_map(c, i):
            return (c * chunks_per_split + i, 0)

    kernel = functools.partial(
        _mask_l1_reduce_kernel,
        lanes=lanes, tile_rows=tile_rows, total_chunks=total_chunks,
        chunks_per_split=chunks_per_split, tail_rows=tail_rows,
        has_duplicate=has_duplicate)

    part_shape = jax.ShapeDtypeStruct((num_splits, SUBLANES, lanes),
                                      jnp.float32)
    part_spec = pl.BlockSpec((1, SUBLANES, lanes), lambda c, i: (c, 0, 0))

    num_parts, den_parts = pl.pallas_call(
        kernel,
        out_shape=(part_shape, part_shape),
        grid=(num_splits, chunks_per_split),
        in_specs=[pl.BlockSpec((tile_rows, lanes), in_map),
                  pl.BlockSpec((tile_rows, lanes), in_map)],
        out_specs=(part_spec, part_spec),
        compiler_params=pltpu.CompilerParams(
            # TODO(synk): on v7x, if plain "parallel" does not shard the
            # leading axis across the two TensorCores, switch that axis to
            # pltpu.CORE_PARALLEL.
            dimension_semantics=("parallel", "arbitrary"),
            vmem_limit_bytes=VMEM_LIMIT),
    )(inp2d, tgt2d)

    num = jnp.sum(num_parts)
    if reduction == "sum":
        return num
    den = jnp.sum(den_parts)    # den == 0 (all targets -100) -> inf/nan, same as PyTorch
    return num / den


def _mask_l1_loss_ref(input_, target, reduction="mean"):
    mask = (target != -100.0).astype(jnp.float32)
    l1 = jnp.abs(input_ * mask - target * mask)
    if reduction == "mean":
        return (l1 * mask).sum() / mask.sum()
    elif reduction == "sum":
        return (l1 * mask).sum()
    return l1 * mask


def _make_data(key, shape, ignore_frac=0.3):
    k1, k2, k3 = jax.random.split(key, 3)
    x = jax.random.normal(k1, shape, dtype=jnp.float32)
    t = jax.random.normal(k2, shape, dtype=jnp.float32)
    ignore = jax.random.uniform(k3, shape) < ignore_frac
    t = jnp.where(ignore, jnp.float32(-100.0), t)
    return x, t


if __name__ == "__main__":
    key = jax.random.PRNGKey(0)
    k_small, k_big, k_odd = jax.random.split(key, 3)

    # Small NCHW case, as the PyTorch module would receive.
    x, t = _make_data(k_small, (2, 4, 16, 16))
    out_mean = mask_l1_loss(x, t, reduction="mean")
    out_sum = mask_l1_loss(x, t, reduction="sum")
    out_none = mask_l1_loss(x, t, reduction="none")
    jax.block_until_ready((out_mean, out_sum, out_none))

    assert jnp.allclose(out_mean, _mask_l1_loss_ref(x, t, "mean"),
                        rtol=1e-4, atol=1e-5)
    assert jnp.allclose(out_sum, _mask_l1_loss_ref(x, t, "sum"),
                        rtol=1e-4, atol=1e-3)
    assert jnp.allclose(out_none, _mask_l1_loss_ref(x, t, "none"),
                        rtol=1e-5, atol=1e-5)

    # Larger case: multi-chunk grid with a partial last block (and, on v7x,
    # the 2-way split / possible clamped duplicate step).
    xb, tb = _make_data(k_big, (4, 8, 128, 160))
    big_mean = mask_l1_loss(xb, tb, reduction="mean")
    big_sum = mask_l1_loss(xb, tb, reduction="sum")
    big_none = mask_l1_loss(xb, tb, reduction="none")
    jax.block_until_ready((big_mean, big_sum, big_none))

    # NOTE: f32 accumulation order differs from the reference; loose atol on
    # the ~500K-term sum is expected, not a bug.
    assert jnp.allclose(big_mean, _mask_l1_loss_ref(xb, tb, "mean"),
                        rtol=1e-4, atol=1e-4)
    assert jnp.allclose(big_sum, _mask_l1_loss_ref(xb, tb, "sum"),
                        rtol=1e-4, atol=1e-1)
    assert jnp.allclose(big_none, _mask_l1_loss_ref(xb, tb, "none"),
                        rtol=1e-5, atol=1e-5)

    # Odd-sized case: numel not a multiple of 128 -> non-lane-dense free view
    # (no padding / no copies), single partial block masked in-kernel.
    xo, to = _make_data(k_odd, (3, 5, 7, 11))
    odd_mean = mask_l1_loss(xo, to, reduction="mean")
    odd_sum = mask_l1_loss(xo, to, reduction="sum")
    odd_none = mask_l1_loss(xo, to, reduction="none")
    jax.block_until_ready((odd_mean, odd_sum, odd_none))

    assert jnp.allclose(odd_mean, _mask_l1_loss_ref(xo, to, "mean"),
                        rtol=1e-4, atol=1e-5)
    assert jnp.allclose(odd_sum, _mask_l1_loss_ref(xo, to, "sum"),
                        rtol=1e-4, atol=1e-3)
    assert jnp.allclose(odd_none, _mask_l1_loss_ref(xo, to, "none"),
                        rtol=1e-5, atol=1e-5)

    print("KERNEL_OK")
</pallas_src>

<mosaic_0001>
module attributes {stable_mosaic.version = 11 : i64} {
  func.func @_mask_l1_reduce_kernel(%arg0: i32, %arg1: i32, %arg2: memref<16x128xf32, #tpu.memory_space<vmem>>, %arg3: memref<16x128xf32, #tpu.memory_space<vmem>>, %arg4: memref<1x8x128xf32, #tpu.memory_space<vmem>>, %arg5: memref<1x8x128xf32, #tpu.memory_space<vmem>>) attributes {dimension_semantics = [#tpu.dimension_semantics<parallel>, #tpu.dimension_semantics<arbitrary>], iteration_bounds = array<i64: 1, 1>, scalar_prefetch = 0 : i64, scratch_operands = 0 : i64, tpu.core_type = #tpu.core_type<tc>, window_params = [{transform_indices = @transform_0, window_bounds = array<i64: 16, 128>}, {transform_indices = @transform_1, window_bounds = array<i64: 16, 128>}, {transform_indices = @transform_2, window_bounds = array<i64: 1, 8, 128>}, {transform_indices = @transform_3, window_bounds = array<i64: 1, 8, 128>}]} {
    %c0_i32 = arith.constant 0 : i32
    %0 = arith.cmpi eq, %arg1, %c0_i32 : i32
    %1 = arith.extui %0 : i1 to i32
    %c0_i32_0 = arith.constant 0 : i32
    %2 = arith.cmpi ne, %1, %c0_i32_0 : i32
    scf.if %2 {
      %cst_19 = arith.constant 0.000000e+00 : f32
      %25 = vector.broadcast %cst_19 : f32 to vector<1x8x128xf32>
      %c0_20 = arith.constant 0 : index
      %c0_21 = arith.constant 0 : index
      %c0_22 = arith.constant 0 : index
      %26 = vector.load %arg4[%c0_20, %c0_21, %c0_22] : memref<1x8x128xf32, #tpu.memory_space<vmem>>, vector<1x8x128xf32>
      tpu.vector_store %arg4[%c0_20, %c0_21, %c0_22], %25 {strides = array<i32>} : memref<1x8x128xf32, #tpu.memory_space<vmem>>, vector<1x8x128xf32>,
      %cst_23 = arith.constant 0.000000e+00 : f32
      %27 = vector.broadcast %cst_23 : f32 to vector<1x8x128xf32>
      %c0_24 = arith.constant 0 : index
      %c0_25 = arith.constant 0 : index
      %c0_26 = arith.constant 0 : index
      %28 = vector.load %arg5[%c0_24, %c0_25, %c0_26] : memref<1x8x128xf32, #tpu.memory_space<vmem>>, vector<1x8x128xf32>
      tpu.vector_store %arg5[%c0_24, %c0_25, %c0_26], %27 {strides = array<i32>} : memref<1x8x128xf32, #tpu.memory_space<vmem>>, vector<1x8x128xf32>,
    } else {
    }
    %c0 = arith.constant 0 : index
    %c0_1 = arith.constant 0 : index
    %3 = vector.load %arg2[%c0, %c0_1] : memref<16x128xf32, #tpu.memory_space<vmem>>, vector<16x128xf32>
    %c0_2 = arith.constant 0 : index
    %c0_3 = arith.constant 0 : index
    %4 = vector.load %arg3[%c0_2, %c0_3] : memref<16x128xf32, #tpu.memory_space<vmem>>, vector<16x128xf32>
    %cst = arith.constant -1.000000e+02 : f32
    %5 = vector.broadcast %cst : f32 to vector<16x128xf32>
    %6 = arith.cmpf one, %4, %5 : vector<16x128xf32>
    %7 = arith.subf %3, %4 : vector<16x128xf32>
    %8 = math.absf %7 : vector<16x128xf32>
    %cst_4 = arith.constant 0.000000e+00 : f32
    %9 = vector.broadcast %cst_4 : f32 to vector<16x128xf32>
    %10 = arith.select %6, %8, %9 : vector<16x128xi1>, vector<16x128xf32>
    %11 = arith.extui %6 : vector<16x128xi1> to vector<16x128xi32>
    %12 = arith.sitofp %11 : vector<16x128xi32> to vector<16x128xf32>
    %c0_5 = arith.constant 0 : index
    %c0_6 = arith.constant 0 : index
    %c0_7 = arith.constant 0 : index
    %13 = vector.load %arg4[%c0_5, %c0_6, %c0_7] : memref<1x8x128xf32, #tpu.memory_space<vmem>>, vector<1x8x128xf32>
    %14 = vector.shape_cast %10 : vector<16x128xf32> to vector<2x8x128xf32>
    %cst_8 = arith.constant dense<0.000000e+00> : vector<8x128xf32>
    %15 = vector.multi_reduction <add>, %14, %cst_8 [0] : vector<2x8x128xf32> to vector<8x128xf32>
    %16 = vector.shape_cast %15 : vector<8x128xf32> to vector<1x8x128xf32>
    %17 = arith.addf %13, %16 : vector<1x8x128xf32>
    %c0_9 = arith.constant 0 : index
    %c0_10 = arith.constant 0 : index
    %c0_11 = arith.constant 0 : index
    %18 = vector.load %arg4[%c0_9, %c0_10, %c0_11] : memref<1x8x128xf32, #tpu.memory_space<vmem>>, vector<1x8x128xf32>
    tpu.vector_store %arg4[%c0_9, %c0_10, %c0_11], %17 {strides = array<i32>} : memref<1x8x128xf32, #tpu.memory_space<vmem>>, vector<1x8x128xf32>,
    %c0_12 = arith.constant 0 : index
    %c0_13 = arith.constant 0 : index
    %c0_14 = arith.constant 0 : index
    %19 = vector.load %arg5[%c0_12, %c0_13, %c0_14] : memref<1x8x128xf32, #tpu.memory_space<vmem>>, vector<1x8x128xf32>
    %20 = vector.shape_cast %12 : vector<16x128xf32> to vector<2x8x128xf32>
    %cst_15 = arith.constant dense<0.000000e+00> : vector<8x128xf32>
    %21 = vector.multi_reduction <add>, %20, %cst_15 [0] : vector<2x8x128xf32> to vector<8x128xf32>
    %22 = vector.shape_cast %21 : vector<8x128xf32> to vector<1x8x128xf32>
    %23 = arith.addf %19, %22 : vector<1x8x128xf32>
    %c0_16 = arith.constant 0 : index
    %c0_17 = arith.constant 0 : index
    %c0_18 = arith.constant 0 : index
    %24 = vector.load %arg5[%c0_16, %c0_17, %c0_18] : memref<1x8x128xf32, #tpu.memory_space<vmem>>, vector<1x8x128xf32>
    tpu.vector_store %arg5[%c0_16, %c0_17, %c0_18], %23 {strides = array<i32>} : memref<1x8x128xf32, #tpu.memory_space<vmem>>, vector<1x8x128xf32>,
    return
  }
  func.func @transform_0(%arg0: i32, %arg1: i32) -> (i32, i32) {
    %c1_i32 = arith.constant 1 : i32
    %0 = arith.muli %arg0, %c1_i32 : i32
    %1 = arith.addi %0, %arg1 : i32
    %c0_i32 = arith.constant 0 : i32
    %c0_i32_0 = arith.constant 0 : i32
    return %1, %c0_i32 : i32, i32
  }
  func.func @transform_1(%arg0: i32, %arg1: i32) -> (i32, i32) {
    %c1_i32 = arith.constant 1 : i32
    %0 = arith.muli %arg0, %c1_i32 : i32
    %1 = arith.addi %0, %arg1 : i32
    %c0_i32 = arith.constant 0 : i32
    %c0_i32_0 = arith.constant 0 : i32
    return %1, %c0_i32 : i32, i32
  }
  func.func @transform_2(%arg0: i32, %arg1: i32) -> (i32, i32, i32) {
    %c0_i32 = arith.constant 0 : i32
    %c0_i32_0 = arith.constant 0 : i32
    %c0_i32_1 = arith.constant 0 : i32
    return %arg0, %c0_i32, %c0_i32_0 : i32, i32, i32
  }
  func.func @transform_3(%arg0: i32, %arg1: i32) -> (i32, i32, i32) {
    %c0_i32 = arith.constant 0 : i32
    %c0_i32_0 = arith.constant 0 : i32
    %c0_i32_1 = arith.constant 0 : i32
    return %arg0, %c0_i32, %c0_i32_0 : i32, i32, i32
  }
}

</mosaic_0001>

<bundles_post_ra>
// kernel: tpu_custom_call.1
= control target key start
LH: loop header
LB: loop body
LE: loop exit
PB: predicated region body
PF: predicated region fallthrough
CT: control target
= control target key end

     0   :  { %9 = vsyncpa [#allocation3], 0  ;;  %s295_s0 = inlined_call_operand.hbm [shape: f32[16,128], index: 0, kind: input, shape index: {}]   ;;  %s296_s1 = inlined_call_operand.hbm [shape: f32[16,128], index: 1, kind: input, shape index: {}]   ;;  %s297_s2 = inlined_call_operand.hbm [shape: f32[1,8,128], index: 2, kind: output, shape index: {0}]   ;;  %s298_s3 = inlined_call_operand.hbm [shape: f32[1,8,128], index: 3, kind: output, shape index: {1}]  }
   0x1   :  { %10 = vsyncpa [#allocation6], 0 }
   0x2   :  { %11 = vsyncpa [#allocation4], 0 }
   0x3   :  { %12 = vsyncpa [#allocation9], 0  ;;  %s220_s12 = smov [#allocation2]   ;;  %s124_s16 = scalar_lea.hbm %s295_s0, 256 }
   0x4   :  { %s22_s13 = sshll.u32 %s220_s12, 4  ;;  %p125_p0 = scmp.ne.s32.totalorder %s295_s0, %s124_s16  ;;  %s23_s13 = int_to_ptr.vmem [resolvable:$true] %s22_s13 }
   0x5   :  { %p128_p1 = scmp.lt.u32.totalorder %s124_s16, %s295_s0 }
   0x7   :  { %p130_p2 = pnand %p128_p1, %p125_p0 }
   0x9   :  { %133 = shalt.err (!%p130_p2)
}
   0xa   :  { %s134_s21 = scalar_lea.vmem %s23_s13, 256  ;;  %p139_p4 = scmp.lt.s32.totalorder %s23_s13, %s23_s13 }
   0xb   :  { %p135_p3 = scmp.ne.s32.totalorder %s23_s13, %s134_s21  ;;  %p140_p5 = scmp.lt.s32.totalorder %s134_s21, %s134_s21 }
   0xd   :  { %p141_p6 = por %p140_p5, %p139_p4 }
   0xf   :  { %p142_p7 = pnand %p141_p6, %p135_p3 }
  0x11   :  { %145 = shalt.err (!%p142_p7)
}
  0x12   :  { %s221_s22 = smov 128   ;;  %s222_s23 = smov 8  }
  0x13   :  { %28 = dma.hbm_to_vmem [thread:$0]  %s295_s0, 256, %s23_s13, [#allocation3], %s221_s22, %s221_s22, %s222_s23  }
  0x14   :  { %s223_s26 = smov [#allocation5]   ;;  %s146_s30 = scalar_lea.hbm %s296_s1, 256 }
  0x15   :  { %s38_s27 = sshll.u32 %s223_s26, 4  ;;  %p147_p8 = scmp.ne.s32.totalorder %s296_s1, %s146_s30  ;;  %s39_s27 = int_to_ptr.vmem [resolvable:$true] %s38_s27 }
  0x16   :  { %p150_p9 = scmp.lt.u32.totalorder %s146_s30, %s296_s1 }
  0x18   :  { %p152_p10 = pnand %p150_p9, %p147_p8 }
  0x1a   :  { %155 = shalt.err (!%p152_p10)
}
  0x1b   :  { %s156_s8 = scalar_lea.vmem %s39_s27, 256  ;;  %p161_p12 = scmp.lt.s32.totalorder %s39_s27, %s39_s27 }
  0x1c   :  { %p157_p11 = scmp.ne.s32.totalorder %s39_s27, %s156_s8  ;;  %p162_p13 = scmp.lt.s32.totalorder %s156_s8, %s156_s8 }
  0x1e   :  { %p163_p0 = por %p162_p13, %p161_p12 }
  0x20   :  { %p164_p1 = pnand %p163_p0, %p157_p11 }
  0x22   :  { %167 = shalt.err (!%p164_p1)
}
  0x23   :  { %44 = dma.hbm_to_vmem [thread:$0]  %s296_s1, 256, %s39_s27, [#allocation6], %s221_s22, %s221_s22, %s222_s23  }
  0x24   :  { %212 = dma.done.wait [#allocation3], 256  }
  0x25   :  { %213 = vsyncadd [#allocation3], 4294967040 }
  0x26   :  { %214 = dma.done.wait [#allocation6], 256  }
  0x27   :  { %215 = vsyncadd [#allocation6], 4294967040  ;;  %v61_v0 = vld [vmem:[#allocation2] sm:$0xff]  ;;  %v62_v1 = vld [vmem:[#allocation2 + $0x8] sm:$0xff]  ;;  %v224_v6 = vmov 0.0   ;;  %s225_s10 = smov [#allocation8]  }
  0x28   :  { %v63_v2 = vld [vmem:[#allocation5] sm:$0xff]  ;;  %v64_v3 = vld [vmem:[#allocation5 + $0x8] sm:$0xff]  ;;  %s101_s11 = sshll.u32 %s225_s10, 4  ;;  %s226_s1 = smov [#allocation7]   ;;  %s102_s11 = int_to_ptr.vmem [resolvable:$true] %s101_s11 }
  0x29   :  { %vm65_vm0 = vcmp.ne.f32.partialorder %v63_v2, -100.0  ;;  %v67_v4 = vsub.f32 %v61_v0, %v63_v2  ;;  %vm66_vm1 = vcmp.ne.f32.partialorder %v64_v3, -100.0  ;;  %v68_v5 = vsub.f32 %v62_v1, %v64_v3  ;;  %s91_s12 = sshll.u32 %s226_s1, 4  ;;  %s168_s13 = scalar_lea.vmem %s102_s11, 128  ;;  %s92_s12 = int_to_ptr.vmem [resolvable:$true] %s91_s12 }
  0x2a   :  { %v115_v7 = vsel %vm65_vm0, 1.0, %v224_v6  ;;  %v116_v9 = vsel %vm66_vm1, 1.0, %v224_v6  ;;  %p169_p2 = scmp.ne.s32.totalorder %s102_s11, %s168_s13  ;;  %p173_p3 = scmp.lt.s32.totalorder %s102_s11, %s102_s11 }
  0x2b   :  { %v69_v8 = vand.u32 2147483647, %v67_v4  ;;  %v70_v10 = vand.u32 2147483647, %v68_v5  ;;  %v82_v11 = vadd.f32 %v116_v9, %v115_v7  ;;  %p174_p4 = scmp.lt.s32.totalorder %s168_s13, %s168_s13 }
  0x2d   :  { %v71_v12 = vsel %vm65_vm0, %v69_v8, 0.0  ;;  %v72_v13 = vsel %vm66_vm1, %v70_v10, 0.0  ;;  %84 = vst [vmem:[#allocation8] sm:$0xff] %v82_v11  ;;  %p175_p5 = por %p174_p4, %p173_p3 }
  0x2e   :  { %v78_v14 = vadd.f32 %v72_v13, %v71_v12 }
  0x2f   :  { %p176_p6 = pnand %p175_p5, %p169_p2 }
  0x31   :  { %179 = shalt.err (!%p176_p6)
}
  0x32   :  { %s180_s16 = scalar_lea.hbm %s298_s3, 128 }
  0x33   :  { %p181_p7 = scmp.ne.s32.totalorder %s298_s3, %s180_s16  ;;  %p184_p8 = scmp.lt.u32.totalorder %s180_s16, %s298_s3 }
  0x35   :  { %p186_p9 = pnand %p184_p8, %p181_p7 }
  0x37   :  { %189 = shalt.err (!%p186_p9)
}
  0x38   :  { %104 = dma.vmem_to_hbm [thread:$0]  %s102_s11, 128, %s298_s3, [#allocation9]   ;;  %80 = vst [vmem:[#allocation7] sm:$0xff] %v78_v14 }
  0x39   :  { %s190_s23 = scalar_lea.vmem %s92_s12, 128  ;;  %p195_p11 = scmp.lt.s32.totalorder %s92_s12, %s92_s12 }
  0x3a   :  { %p191_p10 = scmp.ne.s32.totalorder %s92_s12, %s190_s23  ;;  %p196_p12 = scmp.lt.s32.totalorder %s190_s23, %s190_s23 }
  0x3c   :  { %p197_p13 = por %p196_p12, %p195_p11 }
  0x3e   :  { %p198_p0 = pnand %p197_p13, %p191_p10 }
  0x40   :  { %201 = shalt.err (!%p198_p0)
}
  0x41   :  { %s202_s26 = scalar_lea.hbm %s297_s2, 128 }
  0x42   :  { %p203_p1 = scmp.ne.s32.totalorder %s297_s2, %s202_s26  ;;  %p206_p2 = scmp.lt.u32.totalorder %s202_s26, %s297_s2 }
  0x44   :  { %p208_p3 = pnand %p206_p2, %p203_p1 }
  0x46   :  { %211 = shalt.err (!%p208_p3)
}
  0x47   :  { %94 = dma.vmem_to_hbm [thread:$0]  %s92_s12, 128, %s297_s2, [#allocation4]  }
  0x48   :  { %216 = dma.done.wait [#allocation4], 128  }
  0x49   :  { %217 = vsyncadd [#allocation4], 4294967168 }
  0x4a   :  { %218 = dma.done.wait [#allocation9], 128  }
  0x4b   :  { %219 = vsyncadd [#allocation9], 4294967168 }
  0x4c   :  { %111 = vsyncpa [#allocation3], 1 }
  0x4d   :  { %112 = vsyncpa [#allocation6], 1 }
  0x4e   :  { %113 = vsyncpa [#allocation4], 1 }
  0x4f   :  { %114 = vsyncpa [#allocation9], 1 }

</bundles_post_ra>
